<compile_context>
chip_gen: v5e
topology: v5e:2x2
jax: 0.10.0
libtpu: 0.0.40
codegen_flags: <defaults>
</compile_context>

<pallas_src>
import math

import jax
import jax.numpy as jnp
from jax.experimental import pallas as pl
from jax.experimental.pallas import tpu as pltpu

LANE = 128
SUBLANE = 8


def _round_up(x: int, m: int) -> int:
    return ((x + m - 1) // m) * m


def _hidden_sizes(input_size: int, output_size: int, num_hidden: int):
    """Mirror of the PyTorch hidden-size schedule."""
    step = max(int((input_size - output_size) / (num_hidden + 1)), 1)
    return [max(input_size - i * step, output_size) for i in range(1, num_hidden + 1)]


def _mlp_kernel(x_ref, w1_ref, b1_ref, w2_ref, b2_ref, w3_ref, b3_ref,
                w4_ref, b4_ref, o_ref):
    """One batch tile: 3x (matmul + bias + relu), 1x (matmul + bias). All lane-padded."""
    h = jnp.dot(x_ref[...], w1_ref[...], preferred_element_type=jnp.float32)
    h = jnp.maximum(h + b1_ref[...], 0.0)

    h = jnp.dot(h, w2_ref[...], preferred_element_type=jnp.float32)
    h = jnp.maximum(h + b2_ref[...], 0.0)

    h = jnp.dot(h, w3_ref[...], preferred_element_type=jnp.float32)
    h = jnp.maximum(h + b3_ref[...], 0.0)

    out = jnp.dot(h, w4_ref[...], preferred_element_type=jnp.float32)
    o_ref[...] = (out + b4_ref[...]).astype(o_ref.dtype)


def _pad_params(params):
    """Zero-pad every layer's output width (and matching next-layer input) to 128 lanes."""
    padded = []
    prev_out_pad = None
    for li, (w, b) in enumerate(params):
        fan_in, fan_out = w.shape
        in_pad = fan_in if li == 0 else prev_out_pad
        out_pad = _round_up(fan_out, LANE)
        wp = jnp.zeros((in_pad, out_pad), w.dtype).at[:fan_in, :fan_out].set(w)
        bp = jnp.zeros((1, out_pad), b.dtype).at[:, :fan_out].set(b.reshape(1, -1))
        padded.append((wp, bp))
        prev_out_pad = out_pad
    return padded


def event_decoder_fixed_forward(x, params, *, batch_tile=512):
    """params = [(W1, b1), ..., (W4, b4)] with W: (in, out), b: (1, out) (unpadded)."""
    batch, in_features = x.shape
    out_features = params[-1][0].shape[1]

    padded_params = _pad_params(params)
    out_padded = padded_params[-1][0].shape[1]

    # Batch tile: multiple of 8 sublanes, no bigger than the (rounded-up) batch.
    tile_b = max(SUBLANE, min(_round_up(batch_tile, SUBLANE),
                              _round_up(batch, SUBLANE)))
    batch_padded = _round_up(batch, tile_b)
    if batch_padded != batch:
        x = jnp.pad(x, ((0, batch_padded - batch), (0, 0)))

    flat = []
    for w, b in padded_params:
        flat.extend([w, b])

    grid = (batch_padded // tile_b,)

    # x and output stream per batch tile; weights/biases are VMEM-resident
    # (constant block index across the grid -> fetched once, kept in VMEM).
    x_spec = pl.BlockSpec((tile_b, in_features), lambda i: (i, 0))
    weight_specs = [pl.BlockSpec(a.shape, lambda i: (0, 0)) for a in flat]
    out_spec = pl.BlockSpec((tile_b, out_padded), lambda i: (i, 0))

    out = pl.pallas_call(
        _mlp_kernel,
        grid=grid,
        in_specs=[x_spec] + weight_specs,
        out_specs=out_spec,
        out_shape=jax.ShapeDtypeStruct((batch_padded, out_padded), x.dtype),
        compiler_params=pltpu.CompilerParams(
            dimension_semantics=("parallel",)),
    )(x, *flat)

    # Strip batch and lane padding outside the kernel.
    return out[:batch, :out_features]


def init_params(input_size, output_size, num_hidden, key):
    """Deterministic init mimicking nn.Linear's U(-1/sqrt(fan_in), 1/sqrt(fan_in))."""
    hs = _hidden_sizes(input_size, output_size, num_hidden)
    layer_dims = [(input_size, hs[0])]
    layer_dims += [(hs[i], hs[i + 1]) for i in range(num_hidden - 1)]
    layer_dims += [(hs[-1], output_size)]

    params = []
    for (fan_in, fan_out) in layer_dims:
        key, kw, kb = jax.random.split(key, 3)
        bound = 1.0 / math.sqrt(fan_in)
        w = jax.random.uniform(kw, (fan_in, fan_out), jnp.float32, -bound, bound)
        b = jax.random.uniform(kb, (1, fan_out), jnp.float32, -bound, bound)
        params.append((w, b))
    return params


def reference_forward(x, params):
    h = x
    for (w, b) in params[:-1]:
        h = jnp.maximum(jnp.dot(h, w) + b, 0.0)
    w, b = params[-1]
    return jnp.dot(h, w) + b


if __name__ == "__main__":
    input_size = 32
    output_size = 8
    num_hidden = 3

    key = jax.random.PRNGKey(0)
    kx, kx2, kp = jax.random.split(key, 3)
    params = init_params(input_size, output_size, num_hidden, kp)

    # Small batch (matches the module's typical use).
    batch = 2
    x = jax.random.normal(kx, (batch, input_size), jnp.float32)
    out = jax.block_until_ready(event_decoder_fixed_forward(x, params))
    ref = reference_forward(x, params)
    assert out.shape == (batch, output_size)
    assert jnp.allclose(out, ref, atol=1e-5, rtol=1e-5)

    # Larger, non-multiple-of-tile batch to exercise the pipelined batch grid.
    batch2 = 40
    x2 = jax.random.normal(kx2, (batch2, input_size), jnp.float32)
    out2 = jax.block_until_ready(
        event_decoder_fixed_forward(x2, params, batch_tile=16))
    ref2 = reference_forward(x2, params)
    assert out2.shape == (batch2, output_size)
    assert jnp.allclose(out2, ref2, atol=1e-5, rtol=1e-5)

    print("KERNEL_OK")
</pallas_src>

<mosaic_0001>
module attributes {stable_mosaic.version = 11 : i64} {
  func.func @_mlp_kernel(%arg0: i32, %arg1: memref<8x32xf32, #tpu.memory_space<vmem>>, %arg2: memref<32x128xf32, #tpu.memory_space<vmem>>, %arg3: memref<1x128xf32, #tpu.memory_space<vmem>>, %arg4: memref<128x128xf32, #tpu.memory_space<vmem>>, %arg5: memref<1x128xf32, #tpu.memory_space<vmem>>, %arg6: memref<128x128xf32, #tpu.memory_space<vmem>>, %arg7: memref<1x128xf32, #tpu.memory_space<vmem>>, %arg8: memref<128x128xf32, #tpu.memory_space<vmem>>, %arg9: memref<1x128xf32, #tpu.memory_space<vmem>>, %arg10: memref<8x128xf32, #tpu.memory_space<vmem>>) attributes {dimension_semantics = [#tpu.dimension_semantics<parallel>], iteration_bounds = array<i64: 1>, scalar_prefetch = 0 : i64, scratch_operands = 0 : i64, tpu.core_type = #tpu.core_type<tc>, window_params = [{transform_indices = @transform_0, window_bounds = array<i64: 8, 32>}, {pipeline_mode = #tpu.pipeline_mode<synchronous>, transform_indices = @transform_1, window_bounds = array<i64: 32, 128>}, {pipeline_mode = #tpu.pipeline_mode<synchronous>, transform_indices = @transform_2, window_bounds = array<i64: 1, 128>}, {pipeline_mode = #tpu.pipeline_mode<synchronous>, transform_indices = @transform_3, window_bounds = array<i64: 128, 128>}, {pipeline_mode = #tpu.pipeline_mode<synchronous>, transform_indices = @transform_4, window_bounds = array<i64: 1, 128>}, {pipeline_mode = #tpu.pipeline_mode<synchronous>, transform_indices = @transform_5, window_bounds = array<i64: 128, 128>}, {pipeline_mode = #tpu.pipeline_mode<synchronous>, transform_indices = @transform_6, window_bounds = array<i64: 1, 128>}, {pipeline_mode = #tpu.pipeline_mode<synchronous>, transform_indices = @transform_7, window_bounds = array<i64: 128, 128>}, {pipeline_mode = #tpu.pipeline_mode<synchronous>, transform_indices = @transform_8, window_bounds = array<i64: 1, 128>}, {transform_indices = @transform_9, window_bounds = array<i64: 8, 128>}]} {
    %c0 = arith.constant 0 : index
    %c0_0 = arith.constant 0 : index
    %0 = vector.load %arg1[%c0, %c0_0] : memref<8x32xf32, #tpu.memory_space<vmem>>, vector<8x32xf32>
    %c0_1 = arith.constant 0 : index
    %c0_2 = arith.constant 0 : index
    %1 = vector.load %arg2[%c0_1, %c0_2] : memref<32x128xf32, #tpu.memory_space<vmem>>, vector<32x128xf32>
    %cst = arith.constant dense<0.000000e+00> : vector<8x128xf32>
    %2 = tpu.matmul %0, %1, %cst {dimension_numbers = #tpu.dot_dimension_numbers<[1], [0], [0], [1], [0, 0, 1, 1], [], []>} : vector<8x32xf32>, vector<32x128xf32>, vector<8x128xf32> -> vector<8x128xf32>
    %c0_3 = arith.constant 0 : index
    %c0_4 = arith.constant 0 : index
    %3 = vector.load %arg3[%c0_3, %c0_4] : memref<1x128xf32, #tpu.memory_space<vmem>>, vector<1x128xf32>
    %4 = vector.broadcast %3 : vector<1x128xf32> to vector<8x128xf32>
    %5 = arith.addf %2, %4 : vector<8x128xf32>
    %cst_5 = arith.constant 0.000000e+00 : f32
    %6 = vector.broadcast %cst_5 : f32 to vector<8x128xf32>
    %7 = arith.maximumf %5, %6 : vector<8x128xf32>
    %c0_6 = arith.constant 0 : index
    %c0_7 = arith.constant 0 : index
    %8 = vector.load %arg4[%c0_6, %c0_7] : memref<128x128xf32, #tpu.memory_space<vmem>>, vector<128x128xf32>
    %cst_8 = arith.constant dense<0.000000e+00> : vector<8x128xf32>
    %9 = tpu.matmul %7, %8, %cst_8 {dimension_numbers = #tpu.dot_dimension_numbers<[1], [0], [0], [1], [0, 0, 1, 1], [], []>} : vector<8x128xf32>, vector<128x128xf32>, vector<8x128xf32> -> vector<8x128xf32>
    %c0_9 = arith.constant 0 : index
    %c0_10 = arith.constant 0 : index
    %10 = vector.load %arg5[%c0_9, %c0_10] : memref<1x128xf32, #tpu.memory_space<vmem>>, vector<1x128xf32>
    %11 = vector.broadcast %10 : vector<1x128xf32> to vector<8x128xf32>
    %12 = arith.addf %9, %11 : vector<8x128xf32>
    %cst_11 = arith.constant 0.000000e+00 : f32
    %13 = vector.broadcast %cst_11 : f32 to vector<8x128xf32>
    %14 = arith.maximumf %12, %13 : vector<8x128xf32>
    %c0_12 = arith.constant 0 : index
    %c0_13 = arith.constant 0 : index
    %15 = vector.load %arg6[%c0_12, %c0_13] : memref<128x128xf32, #tpu.memory_space<vmem>>, vector<128x128xf32>
    %cst_14 = arith.constant dense<0.000000e+00> : vector<8x128xf32>
    %16 = tpu.matmul %14, %15, %cst_14 {dimension_numbers = #tpu.dot_dimension_numbers<[1], [0], [0], [1], [0, 0, 1, 1], [], []>} : vector<8x128xf32>, vector<128x128xf32>, vector<8x128xf32> -> vector<8x128xf32>
    %c0_15 = arith.constant 0 : index
    %c0_16 = arith.constant 0 : index
    %17 = vector.load %arg7[%c0_15, %c0_16] : memref<1x128xf32, #tpu.memory_space<vmem>>, vector<1x128xf32>
    %18 = vector.broadcast %17 : vector<1x128xf32> to vector<8x128xf32>
    %19 = arith.addf %16, %18 : vector<8x128xf32>
    %cst_17 = arith.constant 0.000000e+00 : f32
    %20 = vector.broadcast %cst_17 : f32 to vector<8x128xf32>
    %21 = arith.maximumf %19, %20 : vector<8x128xf32>
    %c0_18 = arith.constant 0 : index
    %c0_19 = arith.constant 0 : index
    %22 = vector.load %arg8[%c0_18, %c0_19] : memref<128x128xf32, #tpu.memory_space<vmem>>, vector<128x128xf32>
    %cst_20 = arith.constant dense<0.000000e+00> : vector<8x128xf32>
    %23 = tpu.matmul %21, %22, %cst_20 {dimension_numbers = #tpu.dot_dimension_numbers<[1], [0], [0], [1], [0, 0, 1, 1], [], []>} : vector<8x128xf32>, vector<128x128xf32>, vector<8x128xf32> -> vector<8x128xf32>
    %c0_21 = arith.constant 0 : index
    %c0_22 = arith.constant 0 : index
    %24 = vector.load %arg9[%c0_21, %c0_22] : memref<1x128xf32, #tpu.memory_space<vmem>>, vector<1x128xf32>
    %25 = vector.broadcast %24 : vector<1x128xf32> to vector<8x128xf32>
    %26 = arith.addf %23, %25 : vector<8x128xf32>
    %c0_23 = arith.constant 0 : index
    %c0_24 = arith.constant 0 : index
    %27 = vector.load %arg10[%c0_23, %c0_24] : memref<8x128xf32, #tpu.memory_space<vmem>>, vector<8x128xf32>
    tpu.vector_store %arg10[%c0_23, %c0_24], %26 {strides = array<i32>} : memref<8x128xf32, #tpu.memory_space<vmem>>, vector<8x128xf32>,
    return
  }
  func.func @transform_0(%arg0: i32) -> (i32, i32) {
    %c0_i32 = arith.constant 0 : i32
    %c0_i32_0 = arith.constant 0 : i32
    return %arg0, %c0_i32 : i32, i32
  }
  func.func @transform_1(%arg0: i32) -> (i32, i32) {
    %c0_i32 = arith.constant 0 : i32
    %c0_i32_0 = arith.constant 0 : i32
    %c0_i32_1 = arith.constant 0 : i32
    return %c0_i32, %c0_i32_0 : i32, i32
  }
  func.func @transform_2(%arg0: i32) -> (i32, i32) {
    %c0_i32 = arith.constant 0 : i32
    %c0_i32_0 = arith.constant 0 : i32
    %c0_i32_1 = arith.constant 0 : i32
    return %c0_i32, %c0_i32_0 : i32, i32
  }
  func.func @transform_3(%arg0: i32) -> (i32, i32) {
    %c0_i32 = arith.constant 0 : i32
    %c0_i32_0 = arith.constant 0 : i32
    %c0_i32_1 = arith.constant 0 : i32
    return %c0_i32, %c0_i32_0 : i32, i32
  }
  func.func @transform_4(%arg0: i32) -> (i32, i32) {
    %c0_i32 = arith.constant 0 : i32
    %c0_i32_0 = arith.constant 0 : i32
    %c0_i32_1 = arith.constant 0 : i32
    return %c0_i32, %c0_i32_0 : i32, i32
  }
  func.func @transform_5(%arg0: i32) -> (i32, i32) {
    %c0_i32 = arith.constant 0 : i32
    %c0_i32_0 = arith.constant 0 : i32
    %c0_i32_1 = arith.constant 0 : i32
    return %c0_i32, %c0_i32_0 : i32, i32
  }
  func.func @transform_6(%arg0: i32) -> (i32, i32) {
    %c0_i32 = arith.constant 0 : i32
    %c0_i32_0 = arith.constant 0 : i32
    %c0_i32_1 = arith.constant 0 : i32
    return %c0_i32, %c0_i32_0 : i32, i32
  }
  func.func @transform_7(%arg0: i32) -> (i32, i32) {
    %c0_i32 = arith.constant 0 : i32
    %c0_i32_0 = arith.constant 0 : i32
    %c0_i32_1 = arith.constant 0 : i32
    return %c0_i32, %c0_i32_0 : i32, i32
  }
  func.func @transform_8(%arg0: i32) -> (i32, i32) {
    %c0_i32 = arith.constant 0 : i32
    %c0_i32_0 = arith.constant 0 : i32
    %c0_i32_1 = arith.constant 0 : i32
    return %c0_i32, %c0_i32_0 : i32, i32
  }
  func.func @transform_9(%arg0: i32) -> (i32, i32) {
    %c0_i32 = arith.constant 0 : i32
    %c0_i32_0 = arith.constant 0 : i32
    return %arg0, %c0_i32 : i32, i32
  }
}

</mosaic_0001>

<bundles_post_ra>
// kernel: tpu_custom_call.1
= control target key start
LH: loop header
LB: loop body
LE: loop exit
PB: predicated region body
PF: predicated region fallthrough
CT: control target
= control target key end

     0   :  { %14 = vsyncpa [#allocation3], 0  ;;  %s538_s0 = inlined_call_operand.hbm [shape: f32[8,32], index: 0, kind: input, shape index: {}]   ;;  %s539_s1 = inlined_call_operand.hbm [shape: f32[32,128], index: 1, kind: input, shape index: {}]   ;;  %s540_s2 = inlined_call_operand.vmem [shape: f32[1,128], index: 2, kind: input, shape index: {}]   ;;  %s541_s3 = inlined_call_operand.hbm [shape: f32[128,128], index: 3, kind: input, shape index: {}]   ;;  %s542_s4 = inlined_call_operand.vmem [shape: f32[1,128], index: 4, kind: input, shape index: {}]   ;;  %s543_s5 = inlined_call_operand.hbm [shape: f32[128,128], index: 5, kind: input, shape index: {}]   ;;  %s544_s6 = inlined_call_operand.vmem [shape: f32[1,128], index: 6, kind: input, shape index: {}]   ;;  %s545_s7 = inlined_call_operand.hbm [shape: f32[128,128], index: 7, kind: input, shape index: {}]   ;;  %s546_s8 = inlined_call_operand.vmem [shape: f32[1,128], index: 8, kind: input, shape index: {}]   ;;  %s547_s9 = inlined_call_operand.hbm [shape: f32[8,128], index: 9, kind: output, shape index: {}]  }
   0x1   :  { %15 = vsyncpa [#allocation6], 0 }
   0x2   :  { %16 = vsyncpa [#allocation9], 0  ;;  %s33_s11 = sshll.u32 %s539_s1, 4  ;;  %s34_s11 = int_to_ptr.hbm [resolvable:$true] %s33_s11 }
   0x3   :  { %17 = vsyncpa [#allocation4], 0  ;;  %s450_s12 = smov [#allocation5]   ;;  %s63_s16 = sshll.u32 %s543_s5, 4  ;;  %s64_s16 = int_to_ptr.hbm [resolvable:$true] %s63_s16 }
   0x4   :  { %s35_s13 = sshll.u32 %s450_s12, 4  ;;  %s451_s17 = smov 128   ;;  %s36_s13 = int_to_ptr.vmem [resolvable:$true] %s35_s13 }
   0x5   :  { %s452_s18 = smov 8   ;;  %s453_s19 = smov [#allocation8]  }
   0x6   :  { %41 = dma.hbm_to_vmem [thread:$0]  %s34_s11, 512, %s36_s13, [#allocation6], %s451_s17, %s451_s17, %s452_s18  }
   0x7   :  { %s65_s20 = sshll.u32 %s453_s19, 4  ;;  %s23_s23 = sshll.u32 %s538_s0, 4  ;;  %s66_s20 = int_to_ptr.vmem [resolvable:$true] %s65_s20  ;;  %s24_s23 = int_to_ptr.hbm [resolvable:$true] %s23_s23 }
   0x8   :  { %71 = dma.hbm_to_vmem [thread:$0]  %s64_s16, 2048, %s66_s20, [#allocation9], %s451_s17, %s451_s17, %s452_s18  }
   0x9   :  { %s48_s25 = sshll.u32 %s541_s3, 4  ;;  %s454_s26 = smov [#allocation2]   ;;  %s49_s25 = int_to_ptr.hbm [resolvable:$true] %s48_s25 }
   0xa   :  { %s25_s27 = sshll.u32 %s454_s26, 4  ;;  %s455_s5 = smov [#allocation7]   ;;  %s26_s27 = int_to_ptr.vmem [resolvable:$true] %s25_s27 }
   0xb   :  { %28 = dma.hbm_to_vmem [thread:$0]  %s24_s23, 128, %s26_s27, [#allocation3]  }
   0xc   :  { %s50_s28 = sshll.u32 %s455_s5, 4  ;;  %s78_s10 = sshll.u32 %s545_s7, 4  ;;  %s51_s28 = int_to_ptr.vmem [resolvable:$true] %s50_s28  ;;  %s79_s10 = int_to_ptr.hbm [resolvable:$true] %s78_s10 }
   0xd   :  { %56 = dma.hbm_to_vmem [thread:$0]  %s49_s25, 2048, %s51_s28, [#allocation6], %s451_s17, %s451_s17, %s452_s18  }
   0xe   :  { %s456_s0 = smov [#allocation10]  }
   0xf   :  { %s80_s11 = sshll.u32 %s456_s0, 4  ;;  %s81_s11 = int_to_ptr.vmem [resolvable:$true] %s80_s11 }
  0x10   :  { %86 = dma.hbm_to_vmem [thread:$0]  %s79_s10, 2048, %s81_s11, [#allocation9], %s451_s17, %s451_s17, %s452_s18  }
  0x11   :  { %442 = dma.done.wait [#allocation3], 128  }
  0x12   :  { %443 = vsyncadd [#allocation3], 4294967168 }
  0x13   :  { %444 = dma.done.wait [#allocation6], 2560  }
  0x14   :  { %445 = vsyncadd [#allocation6], 4294964736 }
  0x15   :  { %446 = dma.done.wait [#allocation9], 4096  }
  0x16   :  { %447 = vsyncadd [#allocation9], 4294963200  ;;  %v113_v0 = vld [vmem:[#allocation5 + $0x18] sm:$0xff]  ;;  %v112_v1 = vld [vmem:[#allocation5 + $0x10] sm:$0xff]  ;;  %vm118_vm0 = vcmask 261120   ;;  %s457_s16 = smov [#allocation11]  }
  0x17   :  { %134 = vmatpush.msra.mxu0 %v113_v0  ;;  %v158_v2 = vld [vmem:[#allocation7 + $0x78] sm:$0xff]  ;;  %v111_v3 = vld [vmem:[#allocation5 + $0x8] sm:$0xff]  ;;  %v157_v4 = vld [vmem:[#allocation7 + $0x70] sm:$0xff]  ;;  %s271_s17 = sshll.u32 %s457_s16, 4  ;;  %s273_s20 = sshll.u32 %s547_s9, 4  ;;  %s272_s17 = int_to_ptr.vmem [resolvable:$true] %s271_s17  ;;  %s274_s20 = int_to_ptr.hbm [resolvable:$true] %s273_s20 }
  0x18   :  { %163 = vmatpush.msra.mxu1 %v158_v2  ;;  %v156_v5 = vld [vmem:[#allocation7 + $0x68] sm:$0xff]  ;;  %v110_v6 = vld [vmem:[#allocation5] sm:$0xff]  ;;  %v109_v7 = vld [vmem:[#allocation2] sm:$0xff] }
  0x19   :  { %135 = vmatpush.msra.mxu0 %v112_v1  ;;  %v155_v8 = vld [vmem:[#allocation7 + $0x60] sm:$0xff]  ;;  %v154_v9 = vld [vmem:[#allocation7 + $0x58] sm:$0xff]  ;;  %v153_v10 = vld [vmem:[#allocation7 + $0x50] sm:$0xff] }
  0x1a   :  { %164 = vmatpush.msra.mxu1 %v157_v4  ;;  %v152_v11 = vld [vmem:[#allocation7 + $0x48] sm:$0xff]  ;;  %v151_v12 = vld [vmem:[#allocation7 + $0x40] sm:$0xff]  ;;  %v150_v13 = vld [vmem:[#allocation7 + $0x38] sm:$0xff] }
  0x1b   :  { %136 = vmatpush.msra.mxu0 %v111_v3  ;;  %v149_v14 = vld [vmem:[#allocation7 + $0x30] sm:$0xff]  ;;  %v148_v15 = vld [vmem:[#allocation7 + $0x28] sm:$0xff]  ;;  %v147_v16 = vld [vmem:[#allocation7 + $0x20] sm:$0xff] }
  0x1c   :  { %165 = vmatpush.msra.mxu1 %v156_v5  ;;  %v146_v17 = vld [vmem:[#allocation7 + $0x18] sm:$0xff]  ;;  %v145_v18 = vld [vmem:[#allocation7 + $0x10] sm:$0xff]  ;;  %v144_v19 = vld [vmem:[#allocation7 + $0x8] sm:$0xff] }
  0x1d   :  { %137 = vmatpush.msra.mxu0 %v110_v6  ;;  %v143_v20 = vld [vmem:[#allocation7] sm:$0xff]  ;;  %v199_v21 = vld [vmem:[#allocation8 + $0x78] sm:$0xff]  ;;  %v198_v22 = vld [vmem:[#allocation8 + $0x70] sm:$0xff] }
  0x1e   :  { %285 = vmatmul.msk.f32.vlgmr.msra.gmra.mxu0 %vm118_vm0, %v109_v7  ;;  %166 = vmatpush.msra.mxu1 %v155_v8  ;;  %v197_v23 = vld [vmem:[#allocation8 + $0x68] sm:$0xff]  ;;  %v196_v24 = vld [vmem:[#allocation8 + $0x60] sm:$0xff]  ;;  %v195_v25 = vld [vmem:[#allocation8 + $0x58] sm:$0xff] }
  0x1f   :  { %204 = vmatpush.msra.mxu2 %v199_v21  ;;  %v194_v26 = vld [vmem:[#allocation8 + $0x50] sm:$0xff]  ;;  %v193_v27 = vld [vmem:[#allocation8 + $0x48] sm:$0xff]  ;;  %v192_v28 = vld [vmem:[#allocation8 + $0x40] sm:$0xff] }
  0x20   :  { %167 = vmatpush.msra.mxu1 %v154_v9  ;;  %v191_v29 = vld [vmem:[#allocation8 + $0x38] sm:$0xff]  ;;  %v190_v30 = vld [vmem:[#allocation8 + $0x30] sm:$0xff]  ;;  %v189_v31 = vld [vmem:[#allocation8 + $0x28] sm:$0xff] }
  0x21   :  { %205 = vmatpush.msra.mxu2 %v198_v22  ;;  %v188_v32 = vld [vmem:[#allocation8 + $0x20] sm:$0xff]  ;;  %v187_v33 = vld [vmem:[#allocation8 + $0x18] sm:$0xff]  ;;  %v186_v38 = vld [vmem:[#allocation8 + $0x10] sm:$0xff] }
  0x22   :  { %168 = vmatpush.msra.mxu1 %v153_v10  ;;  %v294_v34 = vld [vmem:[%s540_s2] ss:$0 sm:$0xff]  ;;  %v185_v39 = vld [vmem:[#allocation8 + $0x8] sm:$0xff]  ;;  %v184_v40 = vld [vmem:[#allocation8] sm:$0xff] }
  0x23   :  { %206 = vmatpush.msra.mxu2 %v197_v23  ;;  %v240_v41 = vld [vmem:[#allocation10 + $0x78] sm:$0xff]  ;;  %v239_v42 = vld [vmem:[#allocation10 + $0x70] sm:$0xff]  ;;  %v238_v43 = vld [vmem:[#allocation10 + $0x68] sm:$0xff] }
  0x24   :  { %169 = vmatpush.msra.mxu1 %v152_v11  ;;  %245 = vmatpush.msra.mxu3 %v240_v41  ;;  %v237_v44 = vld [vmem:[#allocation10 + $0x60] sm:$0xff]  ;;  %v236_v45 = vld [vmem:[#allocation10 + $0x58] sm:$0xff]  ;;  %v235_v46 = vld [vmem:[#allocation10 + $0x50] sm:$0xff] }
  0x25   :  { %207 = vmatpush.msra.mxu2 %v196_v24  ;;  %v234_v47 = vld [vmem:[#allocation10 + $0x48] sm:$0xff]  ;;  %v233_v48 = vld [vmem:[#allocation10 + $0x40] sm:$0xff]  ;;  %v232_v49 = vld [vmem:[#allocation10 + $0x38] sm:$0xff] }
  0x26   :  { %170 = vmatpush.msra.mxu1 %v151_v12  ;;  %246 = vmatpush.msra.mxu3 %v239_v42  ;;  %v231_v50 = vld [vmem:[#allocation10 + $0x30] sm:$0xff]  ;;  %v230_v51 = vld [vmem:[#allocation10 + $0x28] sm:$0xff]  ;;  %v229_v52 = vld [vmem:[#allocation10 + $0x20] sm:$0xff] }
  0x27   :  { %208 = vmatpush.msra.mxu2 %v195_v25  ;;  %v228_v53 = vld [vmem:[#allocation10 + $0x18] sm:$0xff]  ;;  %v227_v58 = vld [vmem:[#allocation10 + $0x10] sm:$0xff]  ;;  %v226_v59 = vld [vmem:[#allocation10 + $0x8] sm:$0xff] }
  0x28   :  { %171 = vmatpush.msra.mxu1 %v150_v13  ;;  %247 = vmatpush.msra.mxu3 %v238_v43  ;;  %v295_v54 = vld [vmem:[%s542_s4] ss:$0 sm:$0xff]  ;;  %v225_v60 = vld [vmem:[#allocation10] sm:$0xff] }
  0x29   :  { %209 = vmatpush.msra.mxu2 %v194_v26  ;;  %v296_v61 = vld [vmem:[%s544_s6] ss:$0 sm:$0xff] }
  0x2a   :  { %172 = vmatpush.msra.mxu1 %v149_v14  ;;  %248 = vmatpush.msra.mxu3 %v237_v44  ;;  %v297_v1 = vld [vmem:[%s546_s8] ss:$0 sm:$0xff] }
  0x2b   :  { %210 = vmatpush.msra.mxu2 %v193_v27 }
  0x2c   :  { %173 = vmatpush.msra.mxu1 %v148_v15  ;;  %249 = vmatpush.msra.mxu3 %v236_v45 }
  0x2d   :  { %211 = vmatpush.msra.mxu2 %v192_v28 }
  0x2e   :  { %174 = vmatpush.msra.mxu1 %v147_v16  ;;  %250 = vmatpush.msra.mxu3 %v235_v46 }
  0x2f   :  { %212 = vmatpush.msra.mxu2 %v191_v29 }
  0x30   :  { %175 = vmatpush.msra.mxu1 %v146_v17  ;;  %251 = vmatpush.msra.mxu3 %v234_v47 }
  0x31   :  { %213 = vmatpush.msra.mxu2 %v190_v30 }
  0x32   :  { %176 = vmatpush.msra.mxu1 %v145_v18  ;;  %252 = vmatpush.msra.mxu3 %v233_v48 }
  0x33   :  { %214 = vmatpush.msra.mxu2 %v189_v31 }
  0x34   :  { %177 = vmatpush.msra.mxu1 %v144_v19  ;;  %253 = vmatpush.msra.mxu3 %v232_v49 }
  0x35   :  { %215 = vmatpush.msra.mxu2 %v188_v32 }
  0x36   :  { %178 = vmatpush.msra.mxu1 %v143_v20  ;;  %254 = vmatpush.msra.mxu3 %v231_v50 }
  0x37   :  { %216 = vmatpush.msra.mxu2 %v187_v33 }
  0x38   :  { %255 = vmatpush.msra.mxu3 %v230_v51 }
  0x39   :  { %217 = vmatpush.msra.mxu2 %v186_v38 }
  0x3a   :  { %256 = vmatpush.msra.mxu3 %v229_v52 }
  0x3b   :  { %218 = vmatpush.msra.mxu2 %v185_v39 }
  0x3c   :  { %257 = vmatpush.msra.mxu3 %v228_v53 }
  0x3d   :  { %219 = vmatpush.msra.mxu2 %v184_v40 }
  0x3e   :  { %258 = vmatpush.msra.mxu3 %v227_v58 }
  0x40   :  { %259 = vmatpush.msra.mxu3 %v226_v59 }
  0x42   :  { %260 = vmatpush.msra.mxu3 %v225_v60 }
  0x9b   :  { %v139_v35 = vpop.f32.mrf.mxu0 }
  0x9c   :  { %v140_v36 = vadd.f32 %v294_v34, %v139_v35 }
  0x9e   :  { %v142_v37 = vmax.f32 %v140_v36, 0.0 }
  0xa0   :  { %179 = vmatmul.f32.vlgmr.msra.gmra.mxu1 %v142_v37 }
 0x11d   :  { %v180_v55 = vpop.f32.mrf.mxu1 }
 0x11e   :  { %v181_v56 = vadd.f32 %v295_v54, %v180_v55 }
 0x120   :  { %v183_v57 = vmax.f32 %v181_v56, 0.0 }
 0x122   :  { %220 = vmatmul.f32.vlgmr.msra.gmra.mxu2 %v183_v57 }
 0x1a5   :  { %v221_v62 = vpop.f32.mrf.mxu2 }
 0x1a6   :  { %v222_v63 = vadd.f32 %v296_v61, %v221_v62 }
 0x1a8   :  { %v224_v0 = vmax.f32 %v222_v63, 0.0 }
 0x1aa   :  { %261 = vmatmul.f32.vlgmr.msra.gmra.mxu3 %v224_v0 }
 0x22d   :  { %v262_v2 = vpop.f32.mrf.mxu3 }
 0x22e   :  { %v263_v3 = vadd.f32 %v297_v1, %v262_v2 }
 0x230   :  { %265 = vst [vmem:[#allocation11] sm:$0xff] %v263_v3 }
 0x231   :  { %276 = dma.vmem_to_hbm [thread:$0]  %s272_s17, 128, %s274_s20, [#allocation4]  }
 0x232   :  { %448 = dma.done.wait [#allocation4], 128  }
 0x233   :  { %449 = vsyncadd [#allocation4], 4294967168 }
 0x234   :  { %281 = vsyncpa [#allocation3], 1 }
 0x235   :  { %282 = vsyncpa [#allocation6], 1 }
 0x236   :  { %283 = vsyncpa [#allocation9], 1 }
 0x237   :  { %284 = vsyncpa [#allocation4], 1 }

</bundles_post_ra>
